<compile_context>
chip_gen: v7x
topology: tpu7x:2x2x1
jax: 0.10.0
libtpu: 0.0.40
codegen_flags: <defaults>
</compile_context>

<pallas_src>
import jax
import jax.numpy as jnp
from jax import lax
from jax.experimental import pallas as pl
from jax.experimental.pallas import tpu as pltpu


# ---------------------------------------------------------------------------
# Kernel 1: fused Q/K/V projection (1x1 convs as one stacked channel matmul).
# ---------------------------------------------------------------------------
def _proj_kernel(x_ref, w_ref, b_ref, q_ref, k_ref, v_ref):
    """Blocks: x (1, C, tn); w (C+2Cq, C) stacked [Wv; Wq; Wk]; b (C+2Cq, 1) f32.

    Outputs (input dtype, bias folded in): q (1, Cq, tn), k (1, Cq, tn),
    v (1, C, tn)."""
    C = v_ref.shape[1]
    Cq = q_ref.shape[1]
    x = x_ref[0]                                                     # (C, tn)
    qkv = jnp.dot(w_ref[...], x,
                  preferred_element_type=jnp.float32) + b_ref[...]  # (C+2Cq, tn)
    v_ref[0] = qkv[:C, :].astype(v_ref.dtype)
    q_ref[0] = qkv[C:C + Cq, :].astype(q_ref.dtype)
    k_ref[0] = qkv[C + Cq:, :].astype(k_ref.dtype)


# ---------------------------------------------------------------------------
# Kernel 2: flash-style attention + residual.
# ---------------------------------------------------------------------------
def _make_flash_kernel(tk, resident_kv, exp_dtype, approx_recip):
    def kernel(x_ref, q_ref, k_ref, v_ref, o_ref, m_s, l_s, acc_s):
        """Grid: (batch, q_block, k_block); k_block innermost reduction.

        Blocks (lane axis = spatial positions):
          x_ref : (1, C, tq)          residual tile
          q_ref : (1, Cq, tq)         precomputed queries
          k_ref : (1, Cq, N) resident | (1, Cq, tk) streamed
          v_ref : (1, C,  N) resident | (1, C,  tk) streamed
          o_ref : (1, C, tq)
        Scratch (persist across the k_block axis, all f32):
          m_s (1, tq), l_s (1, tq), acc_s (C, tq)
        """
        ki = pl.program_id(2)
        cdt = q_ref.dtype                       # MXU operand dtype

        @pl.when(ki == 0)
        def _init():
            m_s[...] = jnp.full(m_s.shape, -jnp.inf, jnp.float32)
            l_s[...] = jnp.zeros(l_s.shape, jnp.float32)
            acc_s[...] = jnp.zeros(acc_s.shape, jnp.float32)

        if resident_kv:
            start = pl.multiple_of(ki * tk, tk)
            k = k_ref[0, :, pl.ds(start, tk)]   # (Cq, tk)
            v = v_ref[0, :, pl.ds(start, tk)]   # (C,  tk)
        else:
            k = k_ref[0]                        # (Cq, tk)
            v = v_ref[0]                        # (C,  tk)

        q = q_ref[0]                            # (Cq, tq)

        # Energy tile, transposed: e[j, i] = <k[:, j], q[:, i]> -> (tk, tq).
        # dot_general contracting dim 0 of both operands: no explicit .T.
        e = lax.dot_general(k, q, (((0,), (0,)), ((), ())),
                            preferred_element_type=jnp.float32)

        # Online softmax over the key axis; stats stay f32 (1, tq) rows that
        # broadcast cleanly over the (C, tq) accumulator.
        m_prev = m_s[...]
        m_new = jnp.maximum(m_prev, jnp.max(e, axis=0, keepdims=True))
        alpha = jnp.exp(m_prev - m_new)                              # (1, tq)
        p = jnp.exp((e - m_new).astype(exp_dtype))                   # (tk, tq)
        l_s[...] = alpha * l_s[...] + jnp.sum(p.astype(jnp.float32),
                                              axis=0, keepdims=True)
        acc_s[...] = alpha * acc_s[...] + jnp.dot(
            v, p.astype(cdt), preferred_element_type=jnp.float32)
        m_s[...] = m_new

        @pl.when(ki == pl.num_programs(2) - 1)
        def _finalize():
            inv_l = pl.reciprocal(l_s[...], approx=approx_recip)
            out = acc_s[...] * inv_l + x_ref[0].astype(jnp.float32)  # residual
            o_ref[0] = out.astype(o_ref.dtype)

    return kernel


# ---------------------------------------------------------------------------
# Sizing helpers.
# ---------------------------------------------------------------------------
def _pick_tile(n, candidates):
    for c in candidates:
        if c <= n and n % c == 0:
            return c
    return n


def _vmem_budget_bytes():
    """3/4 of physical VMEM, capped at 96 MiB; conservative 48 MiB fallback."""
    cap = 64 * 1024 * 1024            # conservative fallback (= v7x physical)
    try:
        info = pltpu.get_tpu_info()
        v = getattr(info, "vmem_capacity_bytes", None)
        if v:
            cap = int(v)
    except Exception:
        pass
    return min((cap * 3) // 4, 96 * 1024 * 1024)


def _bf16_eup_ok():
    """bf16 exp only on v6e/v7x-class chips (v5e and older lack bf16 EUP)."""
    try:
        kind = jax.devices()[0].device_kind.lower()
    except Exception:
        return False
    return not any(v in kind for v in ("v2", "v3", "v4", "v5"))


def _flash_vmem_bytes(C, Cq, N, tq, tk, itemsize, resident):
    kv_n = N if resident else tk
    bufs = 2 * itemsize * (C * tq + Cq * tq + Cq * kv_n + C * kv_n + C * tq)
    scratch = 4 * (C * tq + 2 * tq)
    temps = 4 * 3 * tq * tk           # e / p style f32 intermediates
    return bufs + scratch + temps


# ---------------------------------------------------------------------------
# Wrapper.
# ---------------------------------------------------------------------------
def self_attention(x_nchw, wq, bq, wk, bk, wv, bv, *, tq=None, tk=None,
                   resident_kv=None):
    """SAGAN-style SelfAttention forward: softmax(q^T k) attention + residual.

    x_nchw: (B, C, H, W); wq/wk: (C//8, C); wv: (C, C); biases 1-D.
    """
    B, C, H, W = x_nchw.shape
    N = H * W
    Cq = wq.shape[0]
    dtype = x_nchw.dtype
    itemsize = jnp.dtype(dtype).itemsize

    budget = _vmem_budget_bytes()

    if tq is None:
        tq = _pick_tile(N, (512, 256, 128))
    if tk is None:
        tk = _pick_tile(N, (1024, 512, 256, 128))
    assert N % tq == 0 and N % tk == 0, "tile sizes must divide H*W"
    nq, nk = N // tq, N // tk

    if resident_kv is None:
        resident_kv = _flash_vmem_bytes(C, Cq, N, tq, tk, itemsize,
                                        True) <= budget
    if not resident_kv:
        while (tk > 128 and N % tk == 0 and
               _flash_vmem_bytes(C, Cq, N, tq, tk, itemsize, False) > budget):
            tk //= 2
        nk = N // tk

    vmem_limit = int(budget)

    x_bcn = x_nchw.reshape(B, C, N)

    # Stacked 1x1-conv weights [Wv; Wq; Wk]: the big value slab starts at
    # sublane 0.  Bias math stays f32; projection outputs are stored in the
    # MXU operand dtype so the flash inner loop has no bias adds / casts.
    w_all = jnp.concatenate([wv, wq, wk], axis=0).astype(dtype)     # (C+2Cq, C)
    b_all = jnp.concatenate([bv, bq, bk], axis=0).reshape(
        C + 2 * Cq, 1).astype(jnp.float32)

    tn = _pick_tile(N, (2048, 1024, 512, 256, 128))

    proj_cost = pl.CostEstimate(
        flops=2 * B * N * C * (C + 2 * Cq),
        transcendentals=0,
        bytes_accessed=B * N * itemsize * 2 * (C + Cq)
        + (C + 2 * Cq) * (C + 4) * itemsize)

    q_all, k_all, v_all = pl.pallas_call(
        _proj_kernel,
        out_shape=(jax.ShapeDtypeStruct((B, Cq, N), dtype),
                   jax.ShapeDtypeStruct((B, Cq, N), dtype),
                   jax.ShapeDtypeStruct((B, C, N), dtype)),
        grid_spec=pltpu.PrefetchScalarGridSpec(
            num_scalar_prefetch=0,
            grid=(B, N // tn),
            in_specs=[
                pl.BlockSpec((1, C, tn), lambda b, n: (b, 0, n)),         # x
                pl.BlockSpec((C + 2 * Cq, C), lambda b, n: (0, 0)),       # W
                pl.BlockSpec((C + 2 * Cq, 1), lambda b, n: (0, 0)),       # bias
            ],
            out_specs=(
                pl.BlockSpec((1, Cq, tn), lambda b, n: (b, 0, n)),        # q
                pl.BlockSpec((1, Cq, tn), lambda b, n: (b, 0, n)),        # k
                pl.BlockSpec((1, C, tn), lambda b, n: (b, 0, n)),         # v
            )),
        compiler_params=pltpu.CompilerParams(
            dimension_semantics=("parallel", "parallel"),
            vmem_limit_bytes=vmem_limit),
        cost_estimate=proj_cost,
    )(x_bcn, w_all, b_all)

    # ---- flash attention + residual ----
    if resident_kv:
        # K/V resident per batch: DMA'd once per batch, sliced in-kernel.
        k_spec = pl.BlockSpec((1, Cq, N), lambda b, qi, ki: (b, 0, 0))
        v_spec = pl.BlockSpec((1, C, N), lambda b, qi, ki: (b, 0, 0))
        kv_bytes = B * N * itemsize * (C + Cq)
    else:
        # Fallback: stream K/V tiles (re-read per q-block).
        k_spec = pl.BlockSpec((1, Cq, tk), lambda b, qi, ki: (b, 0, ki))
        v_spec = pl.BlockSpec((1, C, tk), lambda b, qi, ki: (b, 0, ki))
        kv_bytes = B * nq * N * itemsize * (C + Cq)

    exp_dtype = (jnp.bfloat16
                 if (jnp.dtype(dtype) == jnp.dtype(jnp.bfloat16)
                     and _bf16_eup_ok())
                 else jnp.float32)
    approx_recip = jnp.dtype(dtype) != jnp.dtype(jnp.float32)

    flash_cost = pl.CostEstimate(
        flops=2 * B * N * N * (C + Cq),
        transcendentals=B * N * N,
        bytes_accessed=B * N * itemsize * (2 * C + Cq) + kv_bytes)

    out_bcn = pl.pallas_call(
        _make_flash_kernel(tk, resident_kv, exp_dtype, approx_recip),
        out_shape=jax.ShapeDtypeStruct((B, C, N), dtype),
        grid_spec=pltpu.PrefetchScalarGridSpec(
            num_scalar_prefetch=0,
            grid=(B, nq, nk),
            in_specs=[
                pl.BlockSpec((1, C, tq), lambda b, qi, ki: (b, 0, qi)),   # x
                pl.BlockSpec((1, Cq, tq), lambda b, qi, ki: (b, 0, qi)),  # q
                k_spec,                                                   # k
                v_spec,                                                   # v
            ],
            out_specs=pl.BlockSpec((1, C, tq), lambda b, qi, ki: (b, 0, qi)),
            scratch_shapes=[
                pltpu.VMEM((1, tq), jnp.float32),    # running max
                pltpu.VMEM((1, tq), jnp.float32),    # running denom
                pltpu.VMEM((C, tq), jnp.float32),    # output accumulator
            ]),
        compiler_params=pltpu.CompilerParams(
            dimension_semantics=("parallel", "parallel", "arbitrary"),
            vmem_limit_bytes=vmem_limit),
        cost_estimate=flash_cost,
    )(x_bcn, q_all, k_all, v_all)

    return out_bcn.reshape(B, C, H, W)


# ---------------------------------------------------------------------------
# Pure-JAX reference (mirrors the PyTorch module exactly).
# ---------------------------------------------------------------------------
def _reference(x_nchw, wq, bq, wk, bk, wv, bv):
    B, C, H, W = x_nchw.shape
    N = H * W
    x = x_nchw.reshape(B, C, N).astype(jnp.float32)
    q = jnp.einsum('oc,bcn->bon', wq, x) + bq[None, :, None]     # (B, Cq, N)
    k = jnp.einsum('oc,bcn->bon', wk, x) + bk[None, :, None]     # (B, Cq, N)
    v = jnp.einsum('oc,bcn->bon', wv, x) + bv[None, :, None]     # (B, C, N)
    energy = jnp.einsum('bci,bcj->bij', q, k)                    # (B, N, N)
    att = jax.nn.softmax(energy, axis=-1)
    out = jnp.einsum('bcj,bij->bci', v, att)                     # (B, C, N)
    return (out + x).reshape(B, C, H, W)


if __name__ == "__main__":
    # Small shapes consistent with the module (in_dim // 8 >= 1): N = 256 so
    # the kernel tiles the sequence dimension.
    B, C, H, W = 2, 16, 16, 16
    Cq = C // 8

    key = jax.random.PRNGKey(0)
    kx, kwq, kbq, kwk, kbk, kwv, kbv = jax.random.split(key, 7)

    x = jax.random.normal(kx, (B, C, H, W), dtype=jnp.float32)
    scale = 0.1
    wq = scale * jax.random.normal(kwq, (Cq, C), dtype=jnp.float32)
    bq = scale * jax.random.normal(kbq, (Cq,), dtype=jnp.float32)
    wk = scale * jax.random.normal(kwk, (Cq, C), dtype=jnp.float32)
    bk = scale * jax.random.normal(kbk, (Cq,), dtype=jnp.float32)
    wv = scale * jax.random.normal(kwv, (C, C), dtype=jnp.float32)
    bv = scale * jax.random.normal(kbv, (C,), dtype=jnp.float32)

    ref = _reference(x, wq, bq, wk, bk, wv, bv)

    # f32, forced 128x128 tiles, resident K/V: grid (2, 2, 2) exercises the
    # online-softmax carry and the in-kernel dynamic slicing of resident K/V.
    out = jax.block_until_ready(
        self_attention(x, wq, bq, wk, bk, wv, bv, tq=128, tk=128))
    assert out.shape == (B, C, H, W)
    assert jnp.allclose(out, ref, atol=2e-3, rtol=2e-3), "f32 mismatch"

    # f32, forced streamed-K/V fallback path.
    out_s = jax.block_until_ready(
        self_attention(x, wq, bq, wk, bk, wv, bv, tq=128, tk=128,
                       resident_kv=False))
    assert jnp.allclose(out_s, ref, atol=2e-3, rtol=2e-3), "streamed mismatch"

    # bf16 MXU-operand path (f32 accumulation / softmax stats), default tiles.
    out_bf16 = jax.block_until_ready(
        self_attention(x.astype(jnp.bfloat16), wq, bq, wk, bk, wv, bv))
    assert out_bf16.dtype == jnp.bfloat16
    assert jnp.allclose(out_bf16.astype(jnp.float32), ref,
                        atol=6e-2, rtol=6e-2), "bf16 mismatch"

    print("KERNEL_OK")
</pallas_src>

<mosaic_0001>
module attributes {stable_mosaic.version = 11 : i64} {
  func.func @_proj_kernel(%arg0: i32, %arg1: i32, %arg2: memref<1x16x256xf32, #tpu.memory_space<vmem>>, %arg3: memref<20x16xf32, #tpu.memory_space<vmem>>, %arg4: memref<20x1xf32, #tpu.memory_space<vmem>>, %arg5: memref<1x2x256xf32, #tpu.memory_space<vmem>>, %arg6: memref<1x2x256xf32, #tpu.memory_space<vmem>>, %arg7: memref<1x16x256xf32, #tpu.memory_space<vmem>>) attributes {dimension_semantics = [#tpu.dimension_semantics<parallel>, #tpu.dimension_semantics<parallel>], iteration_bounds = array<i64: 2, 1>, scalar_prefetch = 0 : i64, scratch_operands = 0 : i64, tpu.core_type = #tpu.core_type<tc>, window_params = [{transform_indices = @transform_0, window_bounds = array<i64: 1, 16, 256>}, {pipeline_mode = #tpu.pipeline_mode<synchronous>, transform_indices = @transform_1, window_bounds = array<i64: 20, 16>}, {pipeline_mode = #tpu.pipeline_mode<synchronous>, transform_indices = @transform_2, window_bounds = array<i64: 20, 1>}, {transform_indices = @transform_3, window_bounds = array<i64: 1, 2, 256>}, {transform_indices = @transform_4, window_bounds = array<i64: 1, 2, 256>}, {transform_indices = @transform_5, window_bounds = array<i64: 1, 16, 256>}]} {
    %c0 = arith.constant 0 : index
    %c0_0 = arith.constant 0 : index
    %c0_1 = arith.constant 0 : index
    %0 = vector.load %arg2[%c0, %c0_0, %c0_1] : memref<1x16x256xf32, #tpu.memory_space<vmem>>, vector<1x16x256xf32>
    %1 = vector.shape_cast %0 : vector<1x16x256xf32> to vector<16x256xf32>
    %c0_2 = arith.constant 0 : index
    %c0_3 = arith.constant 0 : index
    %2 = vector.load %arg3[%c0_2, %c0_3] : memref<20x16xf32, #tpu.memory_space<vmem>>, vector<20x16xf32>
    %cst = arith.constant dense<0.000000e+00> : vector<20x256xf32>
    %3 = tpu.matmul %2, %1, %cst {dimension_numbers = #tpu.dot_dimension_numbers<[1], [0], [0], [1], [0, 0, 1, 1], [], []>} : vector<20x16xf32>, vector<16x256xf32>, vector<20x256xf32> -> vector<20x256xf32>
    %c0_4 = arith.constant 0 : index
    %c0_5 = arith.constant 0 : index
    %4 = vector.load %arg4[%c0_4, %c0_5] : memref<20x1xf32, #tpu.memory_space<vmem>>, vector<20x1xf32>
    %5 = vector.broadcast %4 : vector<20x1xf32> to vector<20x256xf32>
    %6 = arith.addf %3, %5 : vector<20x256xf32>
    %7 = vector.extract_strided_slice %6 {offsets = [0, 0], sizes = [16, 256], strides = [1, 1]} : vector<20x256xf32> to vector<16x256xf32>
    %c0_6 = arith.constant 0 : index
    %c0_7 = arith.constant 0 : index
    %c0_8 = arith.constant 0 : index
    %8 = vector.load %arg7[%c0_6, %c0_7, %c0_8] : memref<1x16x256xf32, #tpu.memory_space<vmem>>, vector<1x16x256xf32>
    %9 = vector.shape_cast %8 : vector<1x16x256xf32> to vector<16x256xf32>
    %10 = vector.shape_cast %7 : vector<16x256xf32> to vector<1x16x256xf32>
    tpu.vector_store %arg7[%c0_6, %c0_7, %c0_8], %10 {strides = array<i32>} : memref<1x16x256xf32, #tpu.memory_space<vmem>>, vector<1x16x256xf32>,
    %11 = vector.extract_strided_slice %6 {offsets = [16, 0], sizes = [2, 256], strides = [1, 1]} : vector<20x256xf32> to vector<2x256xf32>
    %c0_9 = arith.constant 0 : index
    %c0_10 = arith.constant 0 : index
    %c0_11 = arith.constant 0 : index
    %12 = vector.load %arg5[%c0_9, %c0_10, %c0_11] : memref<1x2x256xf32, #tpu.memory_space<vmem>>, vector<1x2x256xf32>
    %13 = vector.shape_cast %12 : vector<1x2x256xf32> to vector<2x256xf32>
    %14 = vector.shape_cast %11 : vector<2x256xf32> to vector<1x2x256xf32>
    tpu.vector_store %arg5[%c0_9, %c0_10, %c0_11], %14 {strides = array<i32>} : memref<1x2x256xf32, #tpu.memory_space<vmem>>, vector<1x2x256xf32>,
    %15 = vector.extract_strided_slice %6 {offsets = [18, 0], sizes = [2, 256], strides = [1, 1]} : vector<20x256xf32> to vector<2x256xf32>
    %c0_12 = arith.constant 0 : index
    %c0_13 = arith.constant 0 : index
    %c0_14 = arith.constant 0 : index
    %16 = vector.load %arg6[%c0_12, %c0_13, %c0_14] : memref<1x2x256xf32, #tpu.memory_space<vmem>>, vector<1x2x256xf32>
    %17 = vector.shape_cast %16 : vector<1x2x256xf32> to vector<2x256xf32>
    %18 = vector.shape_cast %15 : vector<2x256xf32> to vector<1x2x256xf32>
    tpu.vector_store %arg6[%c0_12, %c0_13, %c0_14], %18 {strides = array<i32>} : memref<1x2x256xf32, #tpu.memory_space<vmem>>, vector<1x2x256xf32>,
    return
  }
  func.func @transform_0(%arg0: i32, %arg1: i32) -> (i32, i32, i32) {
    %c0_i32 = arith.constant 0 : i32
    %c0_i32_0 = arith.constant 0 : i32
    return %arg0, %c0_i32, %arg1 : i32, i32, i32
  }
  func.func @transform_1(%arg0: i32, %arg1: i32) -> (i32, i32) {
    %c0_i32 = arith.constant 0 : i32
    %c0_i32_0 = arith.constant 0 : i32
    %c0_i32_1 = arith.constant 0 : i32
    return %c0_i32, %c0_i32_0 : i32, i32
  }
  func.func @transform_2(%arg0: i32, %arg1: i32) -> (i32, i32) {
    %c0_i32 = arith.constant 0 : i32
    %c0_i32_0 = arith.constant 0 : i32
    %c0_i32_1 = arith.constant 0 : i32
    return %c0_i32, %c0_i32_0 : i32, i32
  }
  func.func @transform_3(%arg0: i32, %arg1: i32) -> (i32, i32, i32) {
    %c0_i32 = arith.constant 0 : i32
    %c0_i32_0 = arith.constant 0 : i32
    return %arg0, %c0_i32, %arg1 : i32, i32, i32
  }
  func.func @transform_4(%arg0: i32, %arg1: i32) -> (i32, i32, i32) {
    %c0_i32 = arith.constant 0 : i32
    %c0_i32_0 = arith.constant 0 : i32
    return %arg0, %c0_i32, %arg1 : i32, i32, i32
  }
  func.func @transform_5(%arg0: i32, %arg1: i32) -> (i32, i32, i32) {
    %c0_i32 = arith.constant 0 : i32
    %c0_i32_0 = arith.constant 0 : i32
    return %arg0, %c0_i32, %arg1 : i32, i32, i32
  }
}

</mosaic_0001>

<bundles_post_ra>
// kernel: tpu_custom_call.1
= control target key start
LH: loop header
LB: loop body
LE: loop exit
PB: predicated region body
PF: predicated region fallthrough
CT: control target
= control target key end

     0   :  { %s1119_s0 = inlined_call_operand.vmem [shape: f32[2,16,256], index: 0, kind: input, shape index: {}]   ;;  %s1120_s1 = inlined_call_operand.vmem [shape: f32[20,16], index: 1, kind: input, shape index: {}]   ;;  %s1121_s2 = inlined_call_operand.vmem [shape: f32[20,1], index: 2, kind: input, shape index: {}]   ;;  %s1122_s3 = inlined_call_operand.hbm [shape: f32[2,2,256], index: 3, kind: output, shape index: {0}]   ;;  %s1123_s4 = inlined_call_operand.hbm [shape: f32[2,2,256], index: 4, kind: output, shape index: {1}]   ;;  %s1124_s5 = inlined_call_operand.hbm [shape: f32[2,16,256], index: 5, kind: output, shape index: {2}]  }
   0x1   :  { %1126 = sst [smem:[#allocation9_spill]] %s1119_s0 }
   0x2   :  { %1127 = sst [smem:[#allocation10_spill]] %s1120_s1 }
   0x3   :  { %1128 = sst [smem:[#allocation11_spill]] %s1121_s2 }
   0x4   :  { %11 = vsyncpa [#allocation3], 0 }
   0x5   :  { %13 = vsyncpa [#allocation3 + $0x1], 0 }
   0x6   :  { %14 = vsyncpa [#allocation5], 0 }
   0x7   :  { %16 = vsyncpa [#allocation5 + $0x1], 0  ;;  %s904_s18 = smov 0   ;;  %s906_s19 = smov 0  }
   0x8   :  { %s908_s20 = smov 0   ;;  %s910_s21 = smov 0  }
   0x9   :  { %s912_s22 = smov 0   ;;  %s914_s23 = smov 0  }
   0xa LB: > { %s619_s24 = sadd.s32 4294967295, %s864_s23   ;;  %s1125_s25 = sadd.s32 4294967294, %s864_s23   ;;  %s864_s23 = sphi %s914_s23, %s22_s23   ;;  %s860_s22 = sphi %s912_s22, %s1139_s22   ;;  %s856_s21 = sphi %s910_s21, %s1138_s21   ;;  %s852_s20 = sphi %s908_s20, %s1137_s20   ;;  %s848_s19 = sphi %s906_s19, %s1136_s19   ;;  %s844_s18 = sphi %s904_s18, %s1135_s18  }
   0xb   : > { %s34_s26 = sadd.s32 1, %s860_s22  ;;  %s113_s27 = sadd.s32 1, %s852_s20 }
   0xc   : > { %p36_p0 = scmp.ge.s32.totalorder %s34_s26, 2  ;;  %p123_p1 = scmp.ne.s32.totalorder %s852_s20, %s848_s19 }
   0xd   : > { %p124_p2 = scmp.eq.s32.totalorder %s619_s24, 1  ;;  %p129_p3 = scmp.ne.s32.totalorder %s848_s19, %s844_s18 }
   0xe   : > { %s1141_s26 = smov (%p36_p0, %s34_s26), 0  ;;  %p130_p5 = scmp.eq.s32.totalorder %s1125_s25, 1 }
   0xf   : > { %p946_p4 = por %p124_p2, %p123_p1  ;;  %s108_s29 = ssub.s32 %s860_s22, %s1141_s26 }
  0x10   : > { %p623_p6 = scmp.ge.s32.totalorder %s864_s23, 1  ;;  %p111_p7 = scmp.eq.s32.totalorder %s108_s29, 0 }
  0x11   : > { %p955_p8 = por %p130_p5, %p129_p3  ;;  %p223_p9 = scmp.lt.s32.totalorder %s864_s23, 3 }
  0x12   : > { %s961_s6 = scalar_select %p111_p7, %s852_s20, %s113_s27  }
  0x13   : > { %p224_p10 = pnand %p623_p6, %p223_p9 }
  0x14   : > { %p266_p11 = scmp.lt.s32.totalorder (!%p224_p10), %s856_s21, 1  ;;  %v866_v0 = vmov (!%p224_p10), 0.0   ;;  %s1131_s2 = sld [smem:[#allocation11_spill]] (!%p224_p10)  ;;  %v867_v3 = vmov (!%p224_p10), 0   ;;  %vm303_vm0 = vcmask (!%p224_p10), 130048   ;;  %v406_v19 = vlaneseq (!%p224_p10) }
  0x15   : > { %227 = sbr.rel (%p224_p10) target bundleno = 320 (0x140), region = 32  ;;  %383 = vmatprep.mubr.f32.mxu1 (!%p224_p10), %v866_v0  ;;  %377 = vmatprep.mubr.f32.mxu0 (!%p224_p10), %v866_v0  ;;  %s1132_s0 = sld [smem:[#allocation9_spill]] (!%p224_p10)  ;;  %v868_v17 = vmov (!%p224_p10), 1983009808  }
  0x16   : > { %725 = vset.pattern.permute.xlu1 (!%p224_p10), %v867_v3  ;;  %724 = vset.pattern.permute.xlu0 (!%p224_p10), %v867_v3  ;;  %s1133_s1 = sld [smem:[#allocation10_spill]] (!%p224_p10)  ;;  %v404_v18 = vunpack.c.l.s4 (!%p224_p10), %v868_v17  ;;  %v407_v29 = vshrl.u32 (!%p224_p10), %v406_v19, 7  ;;  %s645_s16 = sshll.u32 (!%p224_p10), %s856_s21, 6 }
  0x17   : > { %s996_s29 = sand.u32 (!%p224_p10), 1, %s619_s24   ;;  %s1001_s9 = scalar_lea.hbm (!%p224_p10), %s1122_s3, %s645_s16 }
  0x18   : > { %v405_v28 = vunpack.c.0.s8 (!%p224_p10), %v404_v18 }
  0x1a   : > { %v286_v1 = vld [vmem:[%s1131_s2 + $0x8] sm:$0xff] (!%p224_p10)  ;;  %v287_v2 = vld [vmem:[%s1131_s2 + $0x10] sm:$0xf] (!%p224_p10)  ;;  %v285_v4 = vld [vmem:[%s1131_s2] sm:$0xff] (!%p224_p10)  ;;  %v408_v34 = vsub.s32 (!%p224_p10), %v405_v28, %v407_v29 }
  0x1b   : > { %295 = vperm.xlu1 (!%p224_p10), %725, %v286_v1   ;;  %300 = vperm.xlu0 (!%p224_p10), %724, %v287_v2  }
  0x1c   : > { %s267_s11 = scalar_select %p266_p11, %s856_s21, 1  ;;  %v283_v11 = vld [vmem:[%s1133_s1 + $0x8] sm:$0xff]  ;;  %v282_v12 = vld [vmem:[%s1133_s1] sm:$0xff]  ;;  %v284_v13 = vld [vmem:[%s1133_s1 + $0x10] sm:$0xf] }
  0x1d   : > { %s869_s1 = smov [#allocation2]  }
  0x1e   : > { %s644_s12 = sshll.u32 %s267_s11, 5  ;;  %s987_s11 = sand.u32 1, %s848_s19  }
  0x1f   : > { %s273_s17 = scalar_lea.vmem %s1132_s0, %s644_s12  ;;  %290 = vperm.xlu0 %724, %v285_v4   ;;  %s626_s12 = sshll.u32 %s987_s11, 5 }
  0x20   : > { %v279_v5 = vld [vmem:[%s273_s17 + $0x8] sm:$0xff]  ;;  %v281_v6 = vld [vmem:[%s273_s17 + $0x18] sm:$0xff]  ;;  %v278_v7 = vld [vmem:[%s273_s17] sm:$0xff]  ;;  %s624_s13 = sshll.u32 %s987_s11, 2  ;;  %s264_s14 = scalar_lea.vmem [#allocation6], %s626_s12 }
  0x21   : > { %v648_v8 = vpack.c.bf16 %v281_v6, %v279_v5  ;;  %v280_v9 = vld [vmem:[%s273_s17 + $0x10] sm:$0xff]  ;;  %s473_s15 = sshll.u32 %s264_s14, 4  ;;  %s250_s17 = scalar_lea.vmem [#allocation2], %s624_s13  ;;  %s992_s15 = int_to_ptr.vmem [resolvable:$true] %s473_s15 }
  0x22   : > { %v650_v10 = vpack.c.bf16 %v280_v9, %v278_v7  ;;  %s442_s27 = sshll.u32 %s250_s17, 4  ;;  %s1005_s10 = scalar_lea.vmem [#allocation4], %s624_s13  ;;  %s1003_s27 = int_to_ptr.vmem [resolvable:$true] %s442_s27 }
  0x23   : > { %652 = vmatprep.subr.bf16.mxu1 %v648_v8  ;;  %649 = vmatprep.subr.bf16.mxu0 %v648_v8  ;;  %s458_s12 = sshll.u32 %s1005_s10, 4  ;;  %s1012_s0 = scalar_lea.hbm %s1123_s4, %s645_s16  ;;  %s1038_s12 = int_to_ptr.vmem [resolvable:$true] %s458_s12 }
  0x24   : > { %653 = vmatpush1.bf16.msra.mxu1 %v650_v10  ;;  %651 = vmatpush1.bf16.msra.mxu0 %v650_v10  ;;  %s416_s7 = scalar_lea.sflag [#allocation3], %s987_s11  ;;  %s726_s8 = scalar_lea.vmem %s1003_s27, 64 }
  0x25   : > { %p727_p12 = scmp.ne.s32.totalorder %s1003_s27, %s726_s8  ;;  %s730_s2 = sshll.u32 %s869_s1, 4  ;;  %s731_s2 = int_to_ptr.vmem [resolvable:$false] %s730_s2 }
  0x26   : > { %s732_s13 = scalar_lea.vmem %s731_s2, 128  ;;  %p733_p1 = scmp.lt.s32.totalorder %s1003_s27, %s731_s2 }
  0x27   : > { %630 = vmatmul.mubr.msk.f32.vlgmr.msra.gmra.mrb[0].mxu1 %vm303_vm0, %v283_v11  ;;  %629 = vmatmul.mubr.msk.f32.vlgmr.msra.gmra.mrb[0].mxu0 %vm303_vm0, %v282_v12  ;;  %p728_p13 = pnand %p727_p12, %p946_p4  ;;  %p734_p2 = scmp.lt.s32.totalorder %s732_s13, %s726_s8 }
  0x28   : > { %389 = vmatprep.mubr.f32.mxu1 %v866_v0 }
  0x29   : > { %p729_p0 = pneg %p728_p13  ;;  %p735_p3 = por %p734_p2, %p733_p1 }
  0x2b   : > { %631 = vmatmul.mubr.msk.f32.gmra.mrb[2].mxu1 %vm303_vm0, %v284_v13  ;;  %p736_p5 = pnand %p735_p3, %p729_p0 }
  0x9a   : > { %v301_v14 = vpop.permute.xlu0 %300  ;;  %v296_v15 = vpop.permute.xlu1 %295 }
  0x9e   : > { %v291_v16 = vpop.permute.xlu0 %290 }
  0xfa   : > { %v385_v20 = vpop.f32.mrb[0].mxu1  ;;  %v379_v21 = vpop.f32.mrb[0].mxu0 }
  0xfb   : > { %v386_v22 = vadd.f32 %v385_v20, %v296_v15  ;;  %v387_v23 = vpop.f32.mrb[1].mxu1  ;;  %v380_v24 = vadd.f32 %v379_v21, %v291_v16  ;;  %v381_v25 = vpop.f32.mrb[1].mxu0 }
  0xfc   : > { %v388_v26 = vadd.f32 %v387_v23, %v296_v15  ;;  %v382_v27 = vadd.f32 %v381_v25, %v291_v16 }
  0xfd   : > { %398 = vst [vmem:[%s264_s14 + $0x10] sm:$0xff] %v386_v22  ;;  %396 = vst [vmem:[%s264_s14] sm:$0xff] %v380_v24 }
  0xfe   : > { %399 = vst [vmem:[%s264_s14 + $0x18] sm:$0xff] %v388_v26  ;;  %v391_v30 = vpop.f32.mrb[2].mxu1  ;;  %397 = vst [vmem:[%s264_s14 + $0x8] sm:$0xff] %v382_v27  ;;  %s647_s14 = sshll.u32 %s856_s21, 9 }
  0xff   : > { %v392_v31 = vadd.f32 %v391_v30, %v301_v14  ;;  %v393_v32 = vpop.f32.mrb[3].mxu1 }
 0x100   : > { %v394_v33 = vadd.f32 %v393_v32, %v301_v14 }
 0x102   : > { %v402_v35 = vcombine.low %v392_v31, %v394_v33 }
 0x104   : > { %v409_v36 = vrot.slane %v402_v35, %v408_v34  ;;  %632 = vst.sshfl [vmem:[%s250_s17] sm:$0x33 pattern:$0x76325410] %v402_v35 }
 0x105   : > { %739 = shalt.err (!%p736_p5)
}
 0x106   : > { %s740_s25 = scalar_lea.hbm %s1001_s9, 64  ;;  %s744_s1 = scalar_lea.hbm %s1122_s3, 128 }
 0x107   : > { %p741_p6 = scmp.ne.s32.totalorder %s1001_s9, %s740_s25  ;;  %p745_p10 = scmp.lt.u32.totalorder %s1001_s9, %s1122_s3 }
 0x108   : > { %p746_p11 = scmp.lt.u32.totalorder %s744_s1, %s740_s25  ;;  %p748_p13 = scmp.lt.u32.totalorder %s740_s25, %s1001_s9 }
 0x109   : > { %p742_p7 = pnand %p741_p6, %p946_p4 }
 0x10a   : > { %p747_p12 = por %p746_p11, %p745_p10 }
 0x10b   : > { %p743_p9 = pneg %p742_p7 }
 0x10c   : > { %p749_p0 = por %p748_p13, %p747_p12 }
 0x10e   : > { %p750_p1 = pnand %p749_p0, %p743_p9 }
 0x110   : > { %753 = shalt.err (!%p750_p1)
}
 0x111   : > { %654 = dma.vmem_to_hbm [thread:$0]  (%p946_p4), %s1003_s27, 64, %s1001_s9, %s416_s7   ;;  %v412_v37 = vcombine.high %v409_v36, %v409_v36 }
 0x112   : > { %s1045_s13 = scalar_lea.hbm %s1124_s5, %s647_s14  ;;  %s421_s25 = scalar_lea.sflag [#allocation5], %s996_s29 }
 0x113   : > { %414 = vst [vmem:[%s1005_s10] sm:$0xf] %v412_v37  ;;  %s754_s11 = scalar_lea.vmem %s1038_s12, 64  ;;  %s870_s27 = smov [#allocation4]  }
 0x114   : > { %p755_p2 = scmp.ne.s32.totalorder %s1038_s12, %s754_s11  ;;  %s758_s9 = sshll.u32 %s870_s27, 4  ;;  %s759_s9 = int_to_ptr.vmem [resolvable:$false] %s758_s9 }
 0x115   : > { %s760_s7 = scalar_lea.vmem %s759_s9, 128  ;;  %p761_p6 = scmp.lt.s32.totalorder %s1038_s12, %s759_s9 }
 0x116   : > { %p756_p3 = pnand %p755_p2, %p946_p4  ;;  %p762_p7 = scmp.lt.s32.totalorder %s760_s7, %s754_s11 }
 0x118   : > { %p757_p5 = pneg %p756_p3  ;;  %p763_p9 = por %p762_p7, %p761_p6 }
 0x11a   : > { %p764_p10 = pnand %p763_p9, %p757_p5 }
 0x11c   : > { %767 = shalt.err (!%p764_p10)
}
 0x11d   : > { %s768_s21 = scalar_lea.hbm %s1012_s0, 64  ;;  %s772_s16 = scalar_lea.hbm %s1123_s4, 128 }
 0x11e   : > { %p769_p11 = scmp.ne.s32.totalorder %s1012_s0, %s768_s21  ;;  %p773_p0 = scmp.lt.u32.totalorder %s1012_s0, %s1123_s4 }
 0x11f   : > { %p774_p1 = scmp.lt.u32.totalorder %s772_s16, %s768_s21  ;;  %p776_p3 = scmp.lt.u32.totalorder %s768_s21, %s1012_s0 }
 0x120   : > { %p770_p12 = pnand %p769_p11, %p946_p4 }
 0x121   : > { %p775_p2 = por %p774_p1, %p773_p0 }
 0x122   : > { %p771_p13 = pneg %p770_p12 }
 0x123   : > { %p777_p5 = por %p776_p3, %p775_p2 }
 0x125   : > { %p778_p6 = pnand %p777_p5, %p771_p13 }
 0x127   : > { %781 = shalt.err (!%p778_p6)
}
 0x128   : > { %655 = dma.vmem_to_hbm [thread:$0]  (%p946_p4), %s1038_s12, 64, %s1012_s0, %s421_s25  }
 0x129   : > { %s782_s2 = scalar_lea.vmem %s992_s15, 512  ;;  %s871_s24 = smov [#allocation6]  }
 0x12a   : > { %p783_p7 = scmp.ne.s32.totalorder %s992_s15, %s782_s2  ;;  %s786_s8 = sshll.u32 %s871_s24, 4  ;;  %s787_s8 = int_to_ptr.vmem [resolvable:$false] %s786_s8 }
 0x12b   : > { %s788_s11 = scalar_lea.vmem %s787_s8, 1024  ;;  %p789_p11 = scmp.lt.s32.totalorder %s992_s15, %s787_s8 }
 0x12c   : > { %p784_p9 = pnand %p783_p7, %p946_p4  ;;  %p790_p12 = scmp.lt.s32.totalorder %s788_s11, %s782_s2 }
 0x12e   : > { %p785_p10 = pneg %p784_p9  ;;  %p791_p13 = por %p790_p12, %p789_p11 }
 0x130   : > { %p792_p0 = pnand %p791_p13, %p785_p10 }
 0x132   : > { %795 = shalt.err (!%p792_p0)
}
 0x133   : > { %s796_s0 = scalar_lea.hbm %s1045_s13, 512  ;;  %s800_s9 = scalar_lea.hbm %s1124_s5, 1024 }
 0x134   : > { %p797_p1 = scmp.ne.s32.totalorder %s1045_s13, %s796_s0  ;;  %p801_p5 = scmp.lt.u32.totalorder %s1045_s13, %s1124_s5 }
 0x135   : > { %p802_p6 = scmp.lt.u32.totalorder %s800_s9, %s796_s0  ;;  %p804_p9 = scmp.lt.u32.totalorder %s796_s0, %s1045_s13 }
 0x136   : > { %p798_p2 = pnand %p797_p1, %p946_p4 }
 0x137   : > { %p803_p7 = por %p802_p6, %p801_p5 }
 0x138   : > { %p799_p3 = pneg %p798_p2 }
 0x139   : > { %p805_p10 = por %p804_p9, %p803_p7 }
 0x13b   : > { %p806_p11 = pnand %p805_p10, %p799_p3 }
 0x13d   : > { %809 = shalt.err (!%p806_p11)
}
 0x13e   : > { %s872_s10 = smov 256   ;;  %s873_s14 = smov 16  }
 0x13f   : > { %656 = dma.vmem_to_hbm [thread:$0]  (%p946_p4), %s992_s15, 512, %s1045_s13, %s421_s25, %s872_s10, %s872_s10, %s873_s14  }
 0x140 PF: > { %p670_p12 = scmp.ge.s32.totalorder %s864_s23, 2  ;;  %s488_s16 = sand.u32 1, %s844_s18  }
 0x141   : > { %s489_s1 = scalar_lea.sflag [#allocation3], %s488_s16 }
 0x142   : > { %p661_p13 = pnand %p670_p12, %p955_p8 }
 0x144   : > { %835 = dma.done.wait (!%p661_p13), %s489_s1, 64  }
 0x145   : > { %837 = vsyncadd (!%p661_p13), %s489_s1, 4294967232  ;;  %s1134_s17 = sadd.s32 4294967294, %s864_s23  }
 0x146   : > { %s497_s2 = sand.u32 1, %s1134_s17  }
 0x147   : > { %s498_s24 = scalar_lea.sflag [#allocation5], %s497_s2 }
 0x148   : > { %839 = dma.done.wait (!%p661_p13), %s498_s24, 576  }
 0x149   : > { %841 = vsyncadd (!%p661_p13), %s498_s24, 4294966720  ;;  %s22_s23 = sadd.s32 1, %s864_s23   ;;  %s1135_s18 = smov %s848_s19 }
 0x14a   : > { %p19_p4 = scmp.ge.s32.totalorder %s22_s23, 4   ;;  %s1136_s19 = smov %s852_s20 }
 0x14b   : > { %s1137_s20 = smov %s961_s6  ;;  %s1138_s21 = smov %s860_s22 }
 0x14c   : > { %s1139_s22 = smov %s1141_s26  ;;  %21 = sbr.rel (!%p19_p4) target bundleno = 10 (0xa), region = 99 }
 0x153   :  { %512 = vsyncpa [#allocation3], 1 }
 0x154   :  { %514 = vsyncpa [#allocation3 + $0x1], 1 }
 0x155   :  { %515 = vsyncpa [#allocation5], 1 }
 0x156   :  { %517 = vsyncpa [#allocation5 + $0x1], 1 }

</bundles_post_ra>
